<compile_context>
chip_gen: v7x
topology: tpu7x:2x2x1
jax: 0.10.0
libtpu: 0.0.40
codegen_flags: <defaults>
</compile_context>

<pallas_src>
import jax
import jax.numpy as jnp
from jax import lax
from jax.experimental import pallas as pl
from jax.experimental.pallas import tpu as pltpu


def _round_up(n, m):
    return ((n + m - 1) // m) * m


# Contract the feature axis of both operands: (out, in) x (tb, in) -> (out, tb).
_TRANS_B = (((1,), (1,)), ((), ()))


def dqn_kernel(x_ref,
               w1_ref, b1_ref,
               w2_ref, b2_ref,
               w3_ref, b3_ref,
               w4_ref, b4_ref,
               o_ref):
    # x_ref: (tb, input_dim) f32, exactly as it sits in HBM (no wrapper transpose/cast).
    xb = x_ref[...].astype(jnp.bfloat16)                       # cheap VPU cast in-kernel

    # layer 1: Linear(input_dim, 16) + ReLU  -> lane-dense (16, tb)
    h = lax.dot_general(w1_ref[...], xb, _TRANS_B,
                        preferred_element_type=jnp.float32)
    h = jnp.maximum(h + b1_ref[...], 0.0).astype(jnp.bfloat16)
    # layer 2: Linear(16, 32) + ReLU
    h = jnp.dot(w2_ref[...], h, preferred_element_type=jnp.float32)
    h = jnp.maximum(h + b2_ref[...], 0.0).astype(jnp.bfloat16)
    # layer 3: Linear(32, 32) + ReLU
    h = jnp.dot(w3_ref[...], h, preferred_element_type=jnp.float32)
    h = jnp.maximum(h + b3_ref[...], 0.0).astype(jnp.bfloat16)
    # layer 4: Linear(32, output_dim), no activation
    out = jnp.dot(w4_ref[...], h, preferred_element_type=jnp.float32)
    o_ref[...] = (out + b4_ref[...]).astype(o_ref.dtype)       # (out_dim, tb) lane-dense


def dqn_forward(x, params, *, batch_tile=16384, transposed_output=False):
    """x: (B, input_dim) f32. params: w{i} (out, in) f32, b{i} (out, 1) f32.

    Returns (B, output_dim) f32 (PyTorch layout), or (output_dim, B) if
    transposed_output=True (skips the final relayout pass).
    """
    B, input_dim = x.shape
    out_dim = params["w4"].shape[0]

    # Tile is always a multiple of 128 lanes, capped by the batch.
    tb = _round_up(min(batch_tile, B), 128)
    bp = _round_up(B, tb)
    x = x.astype(jnp.float32)
    if bp != B:
        x = jnp.pad(x, ((0, bp - B), (0, 0)))

    # Tiny parameters as bf16 (single-pass MXU), biases f32 columns for lane broadcast.
    ws = [params[f"w{i}"].astype(jnp.bfloat16) for i in (1, 2, 3, 4)]
    bs = [params[f"b{i}"].astype(jnp.float32) for i in (1, 2, 3, 4)]

    # x / out tiles walk the batch axis; parameters are VMEM-resident (constant index).
    in_specs = [pl.BlockSpec((tb, input_dim), lambda i: (i, 0))]
    args = [x]
    for w, b in zip(ws, bs):
        in_specs.append(pl.BlockSpec(w.shape, lambda i: (0, 0)))
        in_specs.append(pl.BlockSpec(b.shape, lambda i: (0, 0)))
        args.extend((w, b))

    # VMEM budget: the (tb, input_dim) f32 tile is lane-padded to 128 in VMEM and
    # double-buffered; leave headroom for the in-kernel bf16 copy and (32, tb) hidden
    # activations.  Cap keeps us under v7x's 64 MiB physical VMEM; v5e/v6e have 128 MiB.
    x_buf = tb * 128 * 4
    o_buf = _round_up(out_dim, 8) * tb * 4
    scratch = tb * 128 * 2 + 6 * 32 * tb * 4
    vmem_limit = int(max(32 << 20, min(96 << 20, 2 * (x_buf + o_buf) + scratch + (8 << 20))))

    flops = 2 * bp * (input_dim * 16 + 16 * 32 + 32 * 32 + 32 * out_dim)
    param_bytes = sum(int(a.size) * a.dtype.itemsize for a in ws + bs)
    bytes_accessed = int(bp * input_dim * 4 + bp * out_dim * 4 + param_bytes)

    out_t = pl.pallas_call(
        dqn_kernel,
        out_shape=jax.ShapeDtypeStruct((out_dim, bp), jnp.float32),
        grid=(bp // tb,),
        in_specs=in_specs,
        out_specs=pl.BlockSpec((out_dim, tb), lambda i: (0, i)),
        compiler_params=pltpu.CompilerParams(
            dimension_semantics=("parallel",),
            vmem_limit_bytes=vmem_limit),
        cost_estimate=pl.CostEstimate(
            flops=flops, transcendentals=0, bytes_accessed=bytes_accessed),
    )(*args)

    if transposed_output:
        return out_t[:, :B]          # (out_dim, B): no output relayout pass
    return out_t.T[:B]               # (B, out_dim): PyTorch module layout


def init_dqn_params(key, input_dim, output_dim):
    """Deterministic init matching nn.Linear (uniform +-1/sqrt(fan_in)).

    Weights PyTorch-style (out_features, in_features); biases (out, 1) columns so they
    broadcast over the lane (batch) axis inside the kernel.
    """
    dims = [(input_dim, 16), (16, 32), (32, 32), (32, output_dim)]
    params = {}
    for idx, (fan_in, fan_out) in enumerate(dims, start=1):
        key, kw, kb = jax.random.split(key, 3)
        bound = 1.0 / (fan_in ** 0.5)
        params[f"w{idx}"] = jax.random.uniform(
            kw, (fan_out, fan_in), jnp.float32, minval=-bound, maxval=bound)
        params[f"b{idx}"] = jax.random.uniform(
            kb, (fan_out, 1), jnp.float32, minval=-bound, maxval=bound)
    return params


def dqn_reference(x, params):
    """Plain-JAX reference mirroring the kernel's numerics (bf16 operands, f32 acc)."""
    xb = x.astype(jnp.bfloat16)
    h = lax.dot_general(params["w1"].astype(jnp.bfloat16), xb, _TRANS_B,
                        preferred_element_type=jnp.float32)
    h = jnp.maximum(h + params["b1"], 0.0).astype(jnp.bfloat16)
    for i in (2, 3):
        w = params[f"w{i}"].astype(jnp.bfloat16)
        h = jnp.dot(w, h, preferred_element_type=jnp.float32)
        h = jnp.maximum(h + params[f"b{i}"], 0.0).astype(jnp.bfloat16)
    w4 = params["w4"].astype(jnp.bfloat16)
    out = jnp.dot(w4, h, preferred_element_type=jnp.float32) + params["b4"]
    return out.T


if __name__ == "__main__":
    key = jax.random.PRNGKey(0)
    input_dim, output_dim, batch = 8, 4, 1000   # non-multiple of 128: exercises padding

    kx, kp = jax.random.split(key)
    x = jax.random.normal(kx, (batch, input_dim), jnp.float32)
    params = init_dqn_params(kp, input_dim, output_dim)

    # Small tile for the demo so the grid has several steps (pipelining exercised);
    # production callers should keep the fat default (16384) or sweep per chip.
    out = jax.block_until_ready(dqn_forward(x, params, batch_tile=256))

    ref = dqn_reference(x, params)
    assert out.shape == (batch, output_dim)
    assert jnp.allclose(out, ref, atol=2e-3, rtol=2e-3), \
        float(jnp.max(jnp.abs(out - ref)))

    print("KERNEL_OK")
</pallas_src>

<mosaic_0001>
module attributes {stable_mosaic.version = 11 : i64} {
  func.func @dqn_kernel(%arg0: i32, %arg1: memref<256x8xf32, #tpu.memory_space<vmem>>, %arg2: memref<16x8xbf16, #tpu.memory_space<vmem>>, %arg3: memref<16x1xf32, #tpu.memory_space<vmem>>, %arg4: memref<32x16xbf16, #tpu.memory_space<vmem>>, %arg5: memref<32x1xf32, #tpu.memory_space<vmem>>, %arg6: memref<32x32xbf16, #tpu.memory_space<vmem>>, %arg7: memref<32x1xf32, #tpu.memory_space<vmem>>, %arg8: memref<4x32xbf16, #tpu.memory_space<vmem>>, %arg9: memref<4x1xf32, #tpu.memory_space<vmem>>, %arg10: memref<4x256xf32, #tpu.memory_space<vmem>>) attributes {dimension_semantics = [#tpu.dimension_semantics<parallel>], iteration_bounds = array<i64: 4>, scalar_prefetch = 0 : i64, scratch_operands = 0 : i64, tpu.core_type = #tpu.core_type<tc>, window_params = [{transform_indices = @transform_0, window_bounds = array<i64: 256, 8>}, {pipeline_mode = #tpu.pipeline_mode<synchronous>, transform_indices = @transform_1, window_bounds = array<i64: 16, 8>}, {pipeline_mode = #tpu.pipeline_mode<synchronous>, transform_indices = @transform_2, window_bounds = array<i64: 16, 1>}, {pipeline_mode = #tpu.pipeline_mode<synchronous>, transform_indices = @transform_3, window_bounds = array<i64: 32, 16>}, {pipeline_mode = #tpu.pipeline_mode<synchronous>, transform_indices = @transform_4, window_bounds = array<i64: 32, 1>}, {pipeline_mode = #tpu.pipeline_mode<synchronous>, transform_indices = @transform_5, window_bounds = array<i64: 32, 32>}, {pipeline_mode = #tpu.pipeline_mode<synchronous>, transform_indices = @transform_6, window_bounds = array<i64: 32, 1>}, {pipeline_mode = #tpu.pipeline_mode<synchronous>, transform_indices = @transform_7, window_bounds = array<i64: 4, 32>}, {pipeline_mode = #tpu.pipeline_mode<synchronous>, transform_indices = @transform_8, window_bounds = array<i64: 4, 1>}, {transform_indices = @transform_9, window_bounds = array<i64: 4, 256>}]} {
    %c0 = arith.constant 0 : index
    %c0_0 = arith.constant 0 : index
    %0 = vector.load %arg1[%c0, %c0_0] : memref<256x8xf32, #tpu.memory_space<vmem>>, vector<256x8xf32>
    %1 = arith.truncf %0 : vector<256x8xf32> to vector<256x8xbf16>
    %c0_1 = arith.constant 0 : index
    %c0_2 = arith.constant 0 : index
    %2 = vector.load %arg2[%c0_1, %c0_2] : memref<16x8xbf16, #tpu.memory_space<vmem>>, vector<16x8xbf16>
    %cst = arith.constant dense<0.000000e+00> : vector<16x256xf32>
    %3 = tpu.matmul %2, %1, %cst {dimension_numbers = #tpu.dot_dimension_numbers<[1], [1], [0], [0], [0, 0, 1, 0], [], []>} : vector<16x8xbf16>, vector<256x8xbf16>, vector<16x256xf32> -> vector<16x256xf32>
    %c0_3 = arith.constant 0 : index
    %c0_4 = arith.constant 0 : index
    %4 = vector.load %arg3[%c0_3, %c0_4] : memref<16x1xf32, #tpu.memory_space<vmem>>, vector<16x1xf32>
    %5 = vector.broadcast %4 : vector<16x1xf32> to vector<16x256xf32>
    %6 = arith.addf %3, %5 : vector<16x256xf32>
    %cst_5 = arith.constant 0.000000e+00 : f32
    %7 = vector.broadcast %cst_5 : f32 to vector<16x256xf32>
    %8 = arith.maximumf %6, %7 : vector<16x256xf32>
    %9 = arith.truncf %8 : vector<16x256xf32> to vector<16x256xbf16>
    %c0_6 = arith.constant 0 : index
    %c0_7 = arith.constant 0 : index
    %10 = vector.load %arg4[%c0_6, %c0_7] : memref<32x16xbf16, #tpu.memory_space<vmem>>, vector<32x16xbf16>
    %cst_8 = arith.constant dense<0.000000e+00> : vector<32x256xf32>
    %11 = tpu.matmul %10, %9, %cst_8 {dimension_numbers = #tpu.dot_dimension_numbers<[1], [0], [0], [1], [0, 0, 1, 1], [], []>} : vector<32x16xbf16>, vector<16x256xbf16>, vector<32x256xf32> -> vector<32x256xf32>
    %c0_9 = arith.constant 0 : index
    %c0_10 = arith.constant 0 : index
    %12 = vector.load %arg5[%c0_9, %c0_10] : memref<32x1xf32, #tpu.memory_space<vmem>>, vector<32x1xf32>
    %13 = vector.broadcast %12 : vector<32x1xf32> to vector<32x256xf32>
    %14 = arith.addf %11, %13 : vector<32x256xf32>
    %cst_11 = arith.constant 0.000000e+00 : f32
    %15 = vector.broadcast %cst_11 : f32 to vector<32x256xf32>
    %16 = arith.maximumf %14, %15 : vector<32x256xf32>
    %17 = arith.truncf %16 : vector<32x256xf32> to vector<32x256xbf16>
    %c0_12 = arith.constant 0 : index
    %c0_13 = arith.constant 0 : index
    %18 = vector.load %arg6[%c0_12, %c0_13] : memref<32x32xbf16, #tpu.memory_space<vmem>>, vector<32x32xbf16>
    %cst_14 = arith.constant dense<0.000000e+00> : vector<32x256xf32>
    %19 = tpu.matmul %18, %17, %cst_14 {dimension_numbers = #tpu.dot_dimension_numbers<[1], [0], [0], [1], [0, 0, 1, 1], [], []>} : vector<32x32xbf16>, vector<32x256xbf16>, vector<32x256xf32> -> vector<32x256xf32>
    %c0_15 = arith.constant 0 : index
    %c0_16 = arith.constant 0 : index
    %20 = vector.load %arg7[%c0_15, %c0_16] : memref<32x1xf32, #tpu.memory_space<vmem>>, vector<32x1xf32>
    %21 = vector.broadcast %20 : vector<32x1xf32> to vector<32x256xf32>
    %22 = arith.addf %19, %21 : vector<32x256xf32>
    %cst_17 = arith.constant 0.000000e+00 : f32
    %23 = vector.broadcast %cst_17 : f32 to vector<32x256xf32>
    %24 = arith.maximumf %22, %23 : vector<32x256xf32>
    %25 = arith.truncf %24 : vector<32x256xf32> to vector<32x256xbf16>
    %c0_18 = arith.constant 0 : index
    %c0_19 = arith.constant 0 : index
    %26 = vector.load %arg8[%c0_18, %c0_19] : memref<4x32xbf16, #tpu.memory_space<vmem>>, vector<4x32xbf16>
    %cst_20 = arith.constant dense<0.000000e+00> : vector<4x256xf32>
    %27 = tpu.matmul %26, %25, %cst_20 {dimension_numbers = #tpu.dot_dimension_numbers<[1], [0], [0], [1], [0, 0, 1, 1], [], []>} : vector<4x32xbf16>, vector<32x256xbf16>, vector<4x256xf32> -> vector<4x256xf32>
    %c0_21 = arith.constant 0 : index
    %c0_22 = arith.constant 0 : index
    %28 = vector.load %arg9[%c0_21, %c0_22] : memref<4x1xf32, #tpu.memory_space<vmem>>, vector<4x1xf32>
    %29 = vector.broadcast %28 : vector<4x1xf32> to vector<4x256xf32>
    %30 = arith.addf %27, %29 : vector<4x256xf32>
    %c0_23 = arith.constant 0 : index
    %c0_24 = arith.constant 0 : index
    %31 = vector.load %arg10[%c0_23, %c0_24] : memref<4x256xf32, #tpu.memory_space<vmem>>, vector<4x256xf32>
    tpu.vector_store %arg10[%c0_23, %c0_24], %30 {strides = array<i32>} : memref<4x256xf32, #tpu.memory_space<vmem>>, vector<4x256xf32>,
    return
  }
  func.func @transform_0(%arg0: i32) -> (i32, i32) {
    %c0_i32 = arith.constant 0 : i32
    %c0_i32_0 = arith.constant 0 : i32
    return %arg0, %c0_i32 : i32, i32
  }
  func.func @transform_1(%arg0: i32) -> (i32, i32) {
    %c0_i32 = arith.constant 0 : i32
    %c0_i32_0 = arith.constant 0 : i32
    %c0_i32_1 = arith.constant 0 : i32
    return %c0_i32, %c0_i32_0 : i32, i32
  }
  func.func @transform_2(%arg0: i32) -> (i32, i32) {
    %c0_i32 = arith.constant 0 : i32
    %c0_i32_0 = arith.constant 0 : i32
    %c0_i32_1 = arith.constant 0 : i32
    return %c0_i32, %c0_i32_0 : i32, i32
  }
  func.func @transform_3(%arg0: i32) -> (i32, i32) {
    %c0_i32 = arith.constant 0 : i32
    %c0_i32_0 = arith.constant 0 : i32
    %c0_i32_1 = arith.constant 0 : i32
    return %c0_i32, %c0_i32_0 : i32, i32
  }
  func.func @transform_4(%arg0: i32) -> (i32, i32) {
    %c0_i32 = arith.constant 0 : i32
    %c0_i32_0 = arith.constant 0 : i32
    %c0_i32_1 = arith.constant 0 : i32
    return %c0_i32, %c0_i32_0 : i32, i32
  }
  func.func @transform_5(%arg0: i32) -> (i32, i32) {
    %c0_i32 = arith.constant 0 : i32
    %c0_i32_0 = arith.constant 0 : i32
    %c0_i32_1 = arith.constant 0 : i32
    return %c0_i32, %c0_i32_0 : i32, i32
  }
  func.func @transform_6(%arg0: i32) -> (i32, i32) {
    %c0_i32 = arith.constant 0 : i32
    %c0_i32_0 = arith.constant 0 : i32
    %c0_i32_1 = arith.constant 0 : i32
    return %c0_i32, %c0_i32_0 : i32, i32
  }
  func.func @transform_7(%arg0: i32) -> (i32, i32) {
    %c0_i32 = arith.constant 0 : i32
    %c0_i32_0 = arith.constant 0 : i32
    %c0_i32_1 = arith.constant 0 : i32
    return %c0_i32, %c0_i32_0 : i32, i32
  }
  func.func @transform_8(%arg0: i32) -> (i32, i32) {
    %c0_i32 = arith.constant 0 : i32
    %c0_i32_0 = arith.constant 0 : i32
    %c0_i32_1 = arith.constant 0 : i32
    return %c0_i32, %c0_i32_0 : i32, i32
  }
  func.func @transform_9(%arg0: i32) -> (i32, i32) {
    %c0_i32 = arith.constant 0 : i32
    %c0_i32_0 = arith.constant 0 : i32
    return %c0_i32, %arg0 : i32, i32
  }
}

</mosaic_0001>

<bundles_post_ra>
// kernel: tpu_custom_call.1
= control target key start
LH: loop header
LB: loop body
LE: loop exit
PB: predicated region body
PF: predicated region fallthrough
CT: control target
= control target key end

     0   :  { %14 = vsyncpa [#allocation3], 0  ;;  %s1282_s0 = inlined_call_operand.vmem [shape: f32[1024,8], index: 0, kind: input, shape index: {}]   ;;  %s1283_s1 = inlined_call_operand.vmem [shape: bf16[16,8], index: 1, kind: input, shape index: {}]   ;;  %s1284_s2 = inlined_call_operand.vmem [shape: f32[16,1], index: 2, kind: input, shape index: {}]   ;;  %s1285_s3 = inlined_call_operand.vmem [shape: bf16[32,16], index: 3, kind: input, shape index: {}]   ;;  %s1286_s4 = inlined_call_operand.vmem [shape: f32[32,1], index: 4, kind: input, shape index: {}]   ;;  %s1287_s5 = inlined_call_operand.vmem [shape: bf16[32,32], index: 5, kind: input, shape index: {}]   ;;  %s1288_s6 = inlined_call_operand.vmem [shape: f32[32,1], index: 6, kind: input, shape index: {}]   ;;  %s1289_s7 = inlined_call_operand.vmem [shape: bf16[4,32], index: 7, kind: input, shape index: {}]   ;;  %s1290_s8 = inlined_call_operand.vmem [shape: f32[4,1], index: 8, kind: input, shape index: {}]   ;;  %s1291_s9 = inlined_call_operand.hbm [shape: f32[4,1024], index: 9, kind: output, shape index: {}]  }
   0x1   :  { %16 = vsyncpa [#allocation3 + $0x1], 0  ;;  %s1066_s30 = smov 0   ;;  %s1068_s10 = smov 0  }
   0x2   :  { %s1070_s11 = smov 0   ;;  %s1072_s12 = smov 0  }
   0x3 LB: > { %s1087_s13 = sadd.s32 4294967295, %s1012_s12   ;;  %s853_s14 = sadd.s32 4294967294, %s1012_s12   ;;  %s1012_s12 = sphi %s1072_s12, %s1297_s12   ;;  %s1008_s11 = sphi %s1070_s11, %s1296_s11   ;;  %s1004_s10 = sphi %s1068_s10, %s1295_s10   ;;  %s1000_s30 = sphi %s1066_s30, %s1294_s30  }
   0x4   : > { %s1091_s15 = sadd.s32 1, %s1012_s12   ;;  %s223_s16 = sadd.s32 1, %s1008_s11 }
   0x5   : > { %s220_s17 = ssub.s32 %s1012_s12, %s1091_s15  ;;  %p233_p0 = scmp.ne.s32.totalorder %s1008_s11, %s1004_s10 }
   0x6   : > { %p221_p1 = scmp.eq.s32.totalorder %s220_s17, 0  ;;  %p234_p2 = scmp.eq.s32.totalorder %s1087_s13, 3 }
   0x7   : > { %p239_p3 = scmp.ne.s32.totalorder %s1004_s10, %s1000_s30  ;;  %p240_p4 = scmp.eq.s32.totalorder %s853_s14, 3 }
   0x8   : > { %s1102_s18 = scalar_select %p221_p1, %s1008_s11, %s223_s16  }
   0x9   : > { %p1104_p5 = por %p234_p2, %p233_p0  ;;  %p1108_p6 = por %p240_p4, %p239_p3 }
   0xa   : > { %p856_p7 = scmp.ge.s32.totalorder %s1012_s12, 1  ;;  %p291_p8 = scmp.lt.s32.totalorder %s1012_s12, 5 }
   0xc   : > { %p292_p9 = pnand %p856_p7, %p291_p8 }
   0xd   : > { %s858_s21 = sshll.u32 (!%p292_p9), %s1087_s13, 5  ;;  %v1118_v0 = vld [vmem:[%s1283_s1] sm:$0xff] (!%p292_p9)   ;;  %vm402_vm0 = vcmask (!%p292_p9), 64512   ;;  %v1014_v2 = vmov (!%p292_p9), 0   ;;  %v386_v3 = vld [vmem:[%s1284_s2 + $0x8] sm:$0xff] (!%p292_p9)  ;;  %v509_v4 = vld [vmem:[%s1286_s4 + $0x10] sm:$0xff] (!%p292_p9) }
   0xe   : > { %295 = sbr.rel (%p292_p9) target bundleno = 1014 (0x3f6), region = 56  ;;  %p328_p10 = scmp.lt.s32.totalorder (!%p292_p9), %s858_s21, 127  ;;  %v385_v1 = vld [vmem:[%s1284_s2] sm:$0xff] (!%p292_p9)  ;;  %943 = vset.pattern.permute.xlu0 (!%p292_p9), %v1014_v2  ;;  %580 = vmatprep.mubr.bf16.mxu1 (!%p292_p9), %v1014_v2  ;;  %v619_v21 = vld [vmem:[%s1288_s6 + $0x10] sm:$0xff] (!%p292_p9)  ;;  %vm541_vm1 = vcmask (!%p292_p9), 130048   ;;  %vm651_vm2 = vcmask (!%p292_p9), 261120  }
   0xf   : > { %893 = vmatprep.mubr.msk.bf16.mxu0 (!%p292_p9), %vm402_vm0, %v1118_v0  ;;  %389 = vperm.xlu0 (!%p292_p9), %943, %v385_v1   ;;  %v617_v17 = vld [vmem:[%s1288_s6] sm:$0xff] (!%p292_p9)  ;;  %s324_s24 = sand.u32 (!%p292_p9), 1, %s1004_s10   ;;  %s876_s26 = sshll.u32 (!%p292_p9), %s1087_s13, 7 }
  0x10   : > { %944 = vset.pattern.permute.xlu1 (!%p292_p9), %v1014_v2  ;;  %v724_v26 = vld [vmem:[%s1290_s8] sm:$0xf] (!%p292_p9)  ;;  %s857_s25 = sshll.u32 (!%p292_p9), %s324_s24, 3  ;;  %s1240_s17 = scalar_lea.hbm (!%p292_p9), %s1291_s9, %s876_s26 }
  0x11   : > { %v507_v1 = vld [vmem:[%s1286_s4] sm:$0xff] (!%p292_p9)  ;;  %s326_s27 = scalar_lea.vmem (!%p292_p9), [#allocation2], %s857_s25  ;;  %s1015_s13 = smov (!%p292_p9), [#allocation2]  }
  0x12   : > { %513 = vperm.xlu1 (!%p292_p9), %944, %v507_v1  }
  0x13   : > { %394 = vperm.xlu0 (!%p292_p9), %943, %v386_v3   ;;  %v508_v3 = vld [vmem:[%s1286_s4 + $0x8] sm:$0xff] (!%p292_p9) }
  0x15   : > { %s1299_s21 = smov (!%p328_p10, %s858_s21), 127 }
  0x16   : > { %s859_s28 = sshll.u32 %s1299_s21, 3  ;;  %518 = vperm.xlu1 %944, %v508_v3   ;;  %s954_s21 = sshll.u32 %s1015_s13, 4  ;;  %s955_s21 = int_to_ptr.vmem [resolvable:$false] %s954_s21 }
  0x17   : > { %s1134_s16 = scalar_lea.vmem %s1282_s0, %s859_s28  ;;  %523 = vperm.xlu0 %943, %v509_v4   ;;  %v510_v4 = vld [vmem:[%s1286_s4 + $0x18] sm:$0xff]  ;;  %s794_s28 = sshll.u32 %s326_s27, 4  ;;  %s1242_s28 = int_to_ptr.vmem [resolvable:$true] %s794_s28 }
  0x18   : > { %v351_v5 = vld [vmem:[%s1134_s16 + $0x80] sm:$0xff]  ;;  %v352_v6 = vld [vmem:[%s1134_s16 + $0x88] sm:$0xff]  ;;  %v353_v10 = vld [vmem:[%s1134_s16 + $0x90] sm:$0xff]  ;;  %s950_s22 = scalar_lea.vmem %s1242_s28, 128  ;;  %s956_s23 = scalar_lea.vmem %s955_s21, 256 }
  0x19   : > { %v335_v7 = vld [vmem:[%s1134_s16] sm:$0xff]  ;;  %v375_v8 = vpack.c.bf16 %v352_v6, %v351_v5  ;;  %v336_v9 = vld [vmem:[%s1134_s16 + $0x8] sm:$0xff]  ;;  %v354_v11 = vld [vmem:[%s1134_s16 + $0x98] sm:$0xff]  ;;  %p951_p11 = scmp.ne.s32.totalorder %s1242_s28, %s950_s22  ;;  %p957_p0 = scmp.lt.s32.totalorder %s1242_s28, %s955_s21 }
  0x1a   : > { %v367_v12 = vpack.c.bf16 %v336_v9, %v335_v7  ;;  %v376_v13 = vpack.c.bf16 %v354_v11, %v353_v10  ;;  %v337_v14 = vld [vmem:[%s1134_s16 + $0x10] sm:$0xff]  ;;  %v338_v15 = vld [vmem:[%s1134_s16 + $0x18] sm:$0xff]  ;;  %v355_v19 = vld [vmem:[%s1134_s16 + $0xa0] sm:$0xff]  ;;  %528 = vperm.xlu1 %944, %v510_v4   ;;  %p958_p1 = scmp.lt.s32.totalorder %s956_s23, %s950_s22 }
  0x1b   : > { %895 = vmatprep.subr.msk.bf16.mxu0 %vm402_vm0, %v375_v8  ;;  %v368_v18 = vpack.c.bf16 %v338_v15, %v337_v14  ;;  %v356_v20 = vld [vmem:[%s1134_s16 + $0xa8] sm:$0xff]  ;;  %623 = vperm.xlu0 %943, %v617_v17   ;;  %v339_v24 = vld [vmem:[%s1134_s16 + $0x20] sm:$0xff]  ;;  %v357_v28 = vld [vmem:[%s1134_s16 + $0xb0] sm:$0xff]  ;;  %p952_p12 = pnand %p951_p11, %p1104_p5 }
  0x1c   : > { %v407_v16 = vsel %vm402_vm0, %v367_v12, 0  ;;  %v377_v23 = vpack.c.bf16 %v356_v20, %v355_v19  ;;  %v340_v25 = vld [vmem:[%s1134_s16 + $0x28] sm:$0xff]  ;;  %v358_v29 = vld [vmem:[%s1134_s16 + $0xb8] sm:$0xff]  ;;  %v341_v32 = vld [vmem:[%s1134_s16 + $0x30] sm:$0xff]  ;;  %p959_p2 = por %p958_p1, %p957_p0 }
  0x1d   : > { %878 = vmatpush3.bf16.xpose.msra.mxu0 %v407_v16  ;;  %v410_v22 = vsel %vm402_vm0, %v368_v18, 0  ;;  %v369_v27 = vpack.c.bf16 %v340_v25, %v339_v24  ;;  %v378_v31 = vpack.c.bf16 %v358_v29, %v357_v28  ;;  %v342_v33 = vld [vmem:[%s1134_s16 + $0x38] sm:$0xff]  ;;  %v359_v35 = vld [vmem:[%s1134_s16 + $0xc0] sm:$0xff]  ;;  %v360_v36 = vld [vmem:[%s1134_s16 + $0xc8] sm:$0xff]  ;;  %p953_p13 = pneg %p952_p12 }
  0x1e   : > { %896 = vmatprep.subr.msk.bf16.mxu0 %vm402_vm0, %v376_v13  ;;  %v370_v34 = vpack.c.bf16 %v342_v33, %v341_v32  ;;  %v379_v38 = vpack.c.bf16 %v360_v36, %v359_v35  ;;  %v343_v39 = vld [vmem:[%s1134_s16 + $0x40] sm:$0xff]  ;;  %v344_v40 = vld [vmem:[%s1134_s16 + $0x48] sm:$0xff]  ;;  %v361_v42 = vld [vmem:[%s1134_s16 + $0xd0] sm:$0xff] }
  0x1f   : > { %633 = vperm.xlu0 %943, %v619_v21   ;;  %v413_v30 = vsel %vm402_vm0, %v369_v27, 0  ;;  %v371_v41 = vpack.c.bf16 %v344_v40, %v343_v39  ;;  %v362_v43 = vld [vmem:[%s1134_s16 + $0xd8] sm:$0xff]  ;;  %v345_v46 = vld [vmem:[%s1134_s16 + $0x50] sm:$0xff]  ;;  %v363_v49 = vld [vmem:[%s1134_s16 + $0xe0] sm:$0xff]  ;;  %p960_p3 = pnand %p959_p2, %p953_p13 }
  0x20   : > { %v416_v37 = vsel %vm402_vm0, %v370_v34, 0  ;;  %v380_v45 = vpack.c.bf16 %v362_v43, %v361_v42  ;;  %v346_v47 = vld [vmem:[%s1134_s16 + $0x58] sm:$0xff]  ;;  %v364_v50 = vld [vmem:[%s1134_s16 + $0xe8] sm:$0xff]  ;;  %v347_v53 = vld [vmem:[%s1134_s16 + $0x60] sm:$0xff] }
  0x21   : > { %v419_v44 = vsel %vm402_vm0, %v371_v41, 0  ;;  %v372_v48 = vpack.c.bf16 %v346_v47, %v345_v46  ;;  %v381_v52 = vpack.c.bf16 %v364_v50, %v363_v49  ;;  %v348_v54 = vld [vmem:[%s1134_s16 + $0x68] sm:$0xff]  ;;  %v365_v56 = vld [vmem:[%s1134_s16 + $0xf0] sm:$0xff]  ;;  %v366_v57 = vld [vmem:[%s1134_s16 + $0xf8] sm:$0xff] }
  0x22   : > { %v373_v55 = vpack.c.bf16 %v348_v54, %v347_v53  ;;  %v382_v59 = vpack.c.bf16 %v366_v57, %v365_v56  ;;  %v349_v60 = vld [vmem:[%s1134_s16 + $0x70] sm:$0xff]  ;;  %v350_v61 = vld [vmem:[%s1134_s16 + $0x78] sm:$0xff]  ;;  %v618_v5 = vld [vmem:[%s1288_s6 + $0x8] sm:$0xff]  ;;  %s780_s16 = scalar_lea.sflag [#allocation3], %s324_s24 }
  0x23   : > { %727 = vperm.xlu0 %943, %v724_v26   ;;  %v422_v51 = vsel %vm402_vm0, %v372_v48, 0  ;;  %v374_v62 = vpack.c.bf16 %v350_v61, %v349_v60  ;;  %628 = vperm.xlu1 %944, %v618_v5   ;;  %v948_v56 = vld [vmem:[%s1287_s5] sm:$0xff]   ;;  %v949_v57 = vld [vmem:[%s1287_s5 + $0x8] sm:$0xff]  }
  0x24   : > { %v425_v58 = vsel %vm402_vm0, %v373_v55, 0 }
  0x25   : > { %880 = vmatpush3.bf16.xpose.msra.mxu0 %v410_v22  ;;  %v428_v63 = vsel %vm402_vm0, %v374_v62, 0  ;;  %v946_v22 = vld [vmem:[%s1285_s3] sm:$0xff]  }
  0x26   : > { %897 = vmatprep.subr.msk.bf16.mxu0 %vm402_vm0, %v377_v23  ;;  %v947_v23 = vld [vmem:[%s1285_s3 + $0x8] sm:$0xff]  }
  0x2d   : > { %882 = vmatpush3.bf16.xpose.msra.mxu0 %v413_v30 }
  0x2e   : > { %898 = vmatprep.subr.msk.bf16.mxu0 %vm402_vm0, %v378_v31 }
  0x35   : > { %884 = vmatpush3.bf16.xpose.msra.mxu0 %v416_v37 }
  0x36   : > { %899 = vmatprep.subr.msk.bf16.mxu0 %vm402_vm0, %v379_v38 }
  0x3d   : > { %886 = vmatpush3.bf16.xpose.msra.mxu0 %v419_v44 }
  0x3e   : > { %900 = vmatprep.subr.msk.bf16.mxu0 %vm402_vm0, %v380_v45 }
  0x45   : > { %888 = vmatpush3.bf16.xpose.msra.mxu0 %v422_v51 }
  0x46   : > { %901 = vmatprep.subr.msk.bf16.mxu0 %vm402_vm0, %v381_v52 }
  0x4d   : > { %890 = vmatpush3.bf16.xpose.msra.mxu0 %v425_v58 }
  0x4e   : > { %902 = vmatprep.subr.msk.bf16.mxu0 %vm402_vm0, %v382_v59 }
  0x55   : > { %892 = vmatpush3.bf16.xpose.msra.mxu0 %v428_v63 }
  0x5c   : > { %894 = vmatmul.mubr.msk.bf16.vlgmr.msra.gmra.mrb[0].mxu0 %vm402_vm0, %v1118_v0  ;;  %v620_v0 = vld [vmem:[%s1288_s6 + $0x18] sm:$0xff] }
  0x5d   : > { %638 = vperm.xlu1 %944, %v620_v0  }
  0x8e   : > { %v390_v6 = vpop.permute.xlu0 %389 }
  0x91   : > { %v514_v24 = vpop.permute.xlu1 %513 }
  0x92   : > { %v395_v10 = vpop.permute.xlu0 %394 }
  0x95   : > { %v519_v28 = vpop.permute.xlu1 %518 }
  0x96   : > { %v524_v39 = vpop.permute.xlu0 %523 }
  0x99   : > { %v529_v44 = vpop.permute.xlu1 %528 }
  0x9a   : > { %v624_v58 = vpop.permute.xlu0 %623 }
  0xa2   : > { %v629_v62 = vpop.permute.xlu1 %628 }
 0x12f   : > { %v488_v7 = vpop.f32.mrb[0].mxu0 }
 0x130   : > { %v489_v8 = vadd.f32 %v488_v7, %v390_v6  ;;  %v490_v9 = vpop.f32.mrb[1].mxu0 }
 0x131   : > { %v491_v11 = vadd.f32 %v490_v9, %v390_v6  ;;  %v492_v12 = vpop.f32.mrb[2].mxu0 }
 0x132   : > { %v493_v13 = vadd.f32 %v492_v12, %v395_v10  ;;  %v494_v14 = vpop.f32.mrb[3].mxu0  ;;  %v497_v16 = vmax.f32 %v489_v8, 0.0 }
 0x133   : > { %v495_v15 = vadd.f32 %v494_v14, %v395_v10  ;;  %v498_v18 = vmax.f32 %v491_v11, 0.0  ;;  %v634_v10 = vpop.permute.xlu0 %633  ;;  %v639_v14 = vpop.permute.xlu1 %638 }
 0x134   : > { %v499_v17 = vmax.f32 %v493_v13, 0.0 }
 0x135   : > { %v500_v19 = vmax.f32 %v495_v15, 0.0 }
 0x136   : > { %v501_v20 = vpack.c.bf16 %v499_v17, %v497_v16 }
 0x137   : > { %v502_v21 = vpack.c.bf16 %v500_v19, %v498_v18 }
 0x139   : > { %548 = vmatprep.subr.bf16.mxu1 %v502_v21 }
 0x13a   : > { %549 = vmatpush1.bf16.msra.mxu1 %v501_v20 }
 0x13d   : > { %864 = vmatmul.mubr.msk.bf16.vlgmr.msra.gmra.mrb[0].mxu1 %vm541_vm1, %v946_v22 }
 0x13e   : > { %590 = vmatprep.mubr.bf16.mxu1 %v1014_v2 }
 0x145   : > { %865 = vmatmul.mubr.msk.bf16.gmra.mrb[4].mxu1 %vm541_vm1, %v947_v23 }
 0x146   : > { %690 = vmatprep.mubr.bf16.mxu1 %v1014_v2 }
 0x210   : > { %v582_v25 = vpop.f32.mrb[0].mxu1 }
 0x211   : > { %v583_v26 = vadd.f32 %v582_v25, %v514_v24  ;;  %v584_v27 = vpop.f32.mrb[1].mxu1 }
 0x212   : > { %v585_v29 = vadd.f32 %v584_v27, %v514_v24  ;;  %v586_v30 = vpop.f32.mrb[2].mxu1  ;;  %v728_v27 = vpop.permute.xlu0 %727 }
 0x213   : > { %v587_v31 = vadd.f32 %v586_v30, %v519_v28  ;;  %v588_v32 = vpop.f32.mrb[3].mxu1  ;;  %v601_v34 = vmax.f32 %v583_v26, 0.0  ;;  %v723_v26 = vld [vmem:[%s1289_s7] sm:$0x3] }
 0x214   : > { %v589_v33 = vadd.f32 %v588_v32, %v519_v28  ;;  %v602_v36 = vmax.f32 %v585_v29, 0.0 }
 0x215   : > { %v603_v35 = vmax.f32 %v587_v31, 0.0 }
 0x216   : > { %v604_v37 = vmax.f32 %v589_v33, 0.0 }
 0x217   : > { %v609_v38 = vpack.c.bf16 %v603_v35, %v601_v34 }
 0x218   : > { %v610_v40 = vpack.c.bf16 %v604_v37, %v602_v36  ;;  %v592_v41 = vpop.f32.mrb[4].mxu1 }
 0x219   : > { %v593_v42 = vadd.f32 %v592_v41, %v524_v39  ;;  %v594_v43 = vpop.f32.mrb[5].mxu1 }
 0x21a   : > { %v595_v45 = vadd.f32 %v594_v43, %v524_v39  ;;  %v596_v46 = vpop.f32.mrb[6].mxu1  ;;  %658 = vmatprep.subr.bf16.mxu1 %v610_v40 }
 0x21b   : > { %v597_v47 = vadd.f32 %v596_v46, %v529_v44  ;;  %v598_v48 = vpop.f32.mrb[7].mxu1  ;;  %659 = vmatpush1.bf16.msra.mxu1 %v609_v38  ;;  %v605_v50 = vmax.f32 %v593_v42, 0.0 }
 0x21c   : > { %v599_v49 = vadd.f32 %v598_v48, %v529_v44  ;;  %v606_v52 = vmax.f32 %v595_v45, 0.0 }
 0x21d   : > { %v607_v51 = vmax.f32 %v597_v47, 0.0 }
 0x21e   : > { %v608_v53 = vmax.f32 %v599_v49, 0.0 }
 0x21f   : > { %v611_v54 = vpack.c.bf16 %v607_v51, %v605_v50 }
 0x220   : > { %v612_v55 = vpack.c.bf16 %v608_v53, %v606_v52 }
 0x222   : > { %660 = vmatprep.subr.bf16.mxu1 %v612_v55 }
 0x223   : > { %661 = vmatpush1.bf16.msra.mxu1 %v611_v54 }
 0x226   : > { %868 = vmatmul.mubr.msk.bf16.vlgmr.msra.gmra.mrb[8].mxu1 %vm651_vm2, %v948_v56 }
 0x227   : > { %700 = vmatprep.mubr.bf16.mxu1 %v1014_v2 }
 0x22e   : > { %869 = vmatmul.mubr.msk.bf16.gmra.mrb[12].mxu1 %vm651_vm2, %v949_v57 }
 0x22f   : > { %765 = vmatprep.mubr.bf16.mxu1 %v1014_v2 }
 0x2f9   : > { %v692_v59 = vpop.f32.mrb[8].mxu1 }
 0x2fa   : > { %v693_v60 = vadd.f32 %v692_v59, %v624_v58  ;;  %v694_v61 = vpop.f32.mrb[9].mxu1 }
 0x2fb   : > { %v695_v63 = vadd.f32 %v694_v61, %v624_v58  ;;  %v696_v1 = vpop.f32.mrb[10].mxu1 }
 0x2fc   : > { %v697_v3 = vadd.f32 %v696_v1, %v629_v62  ;;  %v698_v4 = vpop.f32.mrb[11].mxu1  ;;  %v711_v0 = vmax.f32 %v693_v60, 0.0 }
 0x2fd   : > { %v699_v5 = vadd.f32 %v698_v4, %v629_v62  ;;  %v712_v7 = vmax.f32 %v695_v63, 0.0 }
 0x2fe   : > { %v713_v6 = vmax.f32 %v697_v3, 0.0 }
 0x2ff   : > { %v714_v8 = vmax.f32 %v699_v5, 0.0 }
 0x300   : > { %v719_v9 = vpack.c.bf16 %v713_v6, %v711_v0 }
 0x301   : > { %v720_v11 = vpack.c.bf16 %v714_v8, %v712_v7  ;;  %v702_v12 = vpop.f32.mrb[12].mxu1 }
 0x302   : > { %v703_v13 = vadd.f32 %v702_v12, %v634_v10  ;;  %v704_v2 = vpop.f32.mrb[13].mxu1 }
 0x303   : > { %v705_v15 = vadd.f32 %v704_v2, %v634_v10  ;;  %v706_v16 = vpop.f32.mrb[14].mxu1  ;;  %733 = vmatprep.subr.bf16.mxu1 %v720_v11 }
 0x304   : > { %v707_v17 = vadd.f32 %v706_v16, %v639_v14  ;;  %v708_v18 = vpop.f32.mrb[15].mxu1  ;;  %734 = vmatpush1.bf16.msra.mxu1 %v719_v9  ;;  %v715_v20 = vmax.f32 %v703_v13, 0.0 }
 0x305   : > { %v709_v19 = vadd.f32 %v708_v18, %v639_v14  ;;  %v716_v22 = vmax.f32 %v705_v15, 0.0 }
 0x306   : > { %v717_v21 = vmax.f32 %v707_v17, 0.0 }
 0x307   : > { %v718_v23 = vmax.f32 %v709_v19, 0.0 }
 0x308   : > { %v721_v24 = vpack.c.bf16 %v717_v21, %v715_v20 }
 0x309   : > { %v722_v25 = vpack.c.bf16 %v718_v23, %v716_v22 }
 0x30b   : > { %735 = vmatprep.subr.bf16.mxu1 %v722_v25 }
 0x30c   : > { %736 = vmatpush1.bf16.msra.mxu1 %v721_v24 }
 0x30f   : > { %870 = vmatmul.mubr.msk.bf16.vlgmr.msra.gmra.mrb[16].mxu1 %vm651_vm2, %v723_v26 }
 0x3e2   : > { %v767_v28 = vpop.f32.mrb[16].mxu1 }
 0x3e3   : > { %v768_v29 = vadd.f32 %v767_v28, %v728_v27  ;;  %v769_v30 = vpop.f32.mrb[17].mxu1 }
 0x3e4   : > { %v770_v31 = vadd.f32 %v769_v30, %v728_v27  ;;  %v771_v32 = vpop.f32.mrb[18].mxu1 }
 0x3e5   : > { %v772_v33 = vpop.f32.mrb[19].mxu1 }
 0x3e6   : > { %v776_v34 = vcombine.low %v768_v29, %v770_v31 }
 0x3e8   : > { %778 = vst [vmem:[%s326_s27] sm:$0xff] %v776_v34 }
 0x3e9   : > { %963 = shalt.err (!%p960_p3)
}
 0x3ea   : > { %s964_s24 = scalar_lea.hbm %s1240_s17, 128  ;;  %s968_s27 = scalar_lea.hbm %s1291_s9, 512 }
 0x3eb   : > { %p965_p4 = scmp.ne.s32.totalorder %s1240_s17, %s964_s24  ;;  %p969_p9 = scmp.lt.u32.totalorder %s1240_s17, %s1291_s9 }
 0x3ec   : > { %p970_p10 = scmp.lt.u32.totalorder %s968_s27, %s964_s24  ;;  %p972_p12 = scmp.lt.u32.totalorder %s964_s24, %s1240_s17 }
 0x3ed   : > { %p966_p7 = pnand %p965_p4, %p1104_p5 }
 0x3ee   : > { %p971_p11 = por %p970_p10, %p969_p9 }
 0x3ef   : > { %p967_p8 = pneg %p966_p7 }
 0x3f0   : > { %p973_p13 = por %p972_p12, %p971_p11 }
 0x3f2   : > { %p974_p0 = pnand %p973_p13, %p967_p8 }
 0x3f4   : > { %977 = shalt.err (!%p974_p0)
}
 0x3f5   : > { %903 = dma.vmem_to_hbm [thread:$0]  (%p1104_p5), %s1242_s28, 128, %s1240_s17, %s780_s16  }
 0x3f6 PF: > { %p909_p1 = scmp.ge.s32.totalorder %s1012_s12, 2  ;;  %s806_s22 = sand.u32 1, %s1000_s30  }
 0x3f7   : > { %s807_s13 = scalar_lea.sflag [#allocation3], %s806_s22 }
 0x3f8   : > { %p906_p2 = pnand %p909_p1, %p1108_p6 }
 0x3fa   : > { %995 = dma.done.wait (!%p906_p2), %s807_s13, 128  }
 0x3fb   : > { %997 = vsyncadd (!%p906_p2), %s807_s13, 4294967168  ;;  %p19_p3 = scmp.ge.s32.totalorder %s1091_s15, 6   ;;  %s1294_s30 = smov %s1004_s10 }
 0x3fc   : > { %s1295_s10 = smov %s1008_s11  ;;  %s1296_s11 = smov %s1102_s18 }
 0x3fd   : > { %s1297_s12 = smov %s1091_s15  ;;  %21 = sbr.rel (!%p19_p3) target bundleno = 3 (0x3), region = 91 }
 0x404   :  { %812 = vsyncpa [#allocation3], 1 }
 0x405   :  { %814 = vsyncpa [#allocation3 + $0x1], 1 }

</bundles_post_ra>
